<compile_context>
chip_gen: v5e
topology: v5e:2x2
jax: 0.10.0
libtpu: 0.0.40
codegen_flags: <defaults>
</compile_context>

<pallas_src>
import functools
import math

import jax
import jax.numpy as jnp
import numpy as np
from jax import lax
from jax.experimental import pallas as pl
from jax.experimental.pallas import tpu as pltpu

_LANES = 128
_SUBLANES = 8
_MAX_TILE_ROWS = 4096   # 2 MiB of f32 prob per grid step; ~4-5 MiB double-buffered


def _cdiv(a, b):
    return -(-a // b)


def _round_up(x, m):
    return _cdiv(x, m) * m


def _plan_tiles(rows, unit):
    """Pick (tile_rows, num_tiles).

    Tiles are aligned to `unit` rows (sublane + whole-anchor alignment), capped at
    _MAX_TILE_ROWS, and — when there is enough work — split into an even number of
    balanced tiles so the "parallel" grid axis keeps both TensorCores busy (v7x).
    """
    unit = max(int(unit), 1)
    max_tile = max(unit, (_MAX_TILE_ROWS // unit) * unit)
    min_tiles = 2 if rows > unit else 1
    num_tiles = max(min_tiles, _cdiv(rows, max_tile))
    if num_tiles > 1 and num_tiles % 2:
        num_tiles += 1                       # even tile count -> balanced megacore split
    tile_rows = _round_up(_cdiv(rows, num_tiles), unit)
    num_tiles = _cdiv(rows, tile_rows)
    return tile_rows, num_tiles


def _focal_terms(prob, is_pos, *, gamma, alpha):
    """Negated per-element focal term: alpha_e * (1-pt)^gamma * max(log(pt), -100).

    The wrapper negates the final sum once, saving one VPU negate per element.
    binary_cross_entropy(prob, one_hot) == -log(pt) with PyTorch's -100 log clamp,
    i.e. ce = min(-log(pt), 100) = -max(log(pt), -100).
    """
    q = 1.0 - prob
    pt = jnp.where(is_pos, prob, q)
    one_minus_pt = jnp.where(is_pos, q, prob)
    neg_ce = jnp.maximum(jnp.log(pt), jnp.float32(-100.0))   # log on the EUP

    g = float(gamma)
    if g == 2.0:                                   # common case: one VPU multiply
        mod = one_minus_pt * one_minus_pt
    elif g.is_integer() and 0.0 <= g <= 8.0:       # small integer gamma: repeated mul
        mod = jnp.ones_like(one_minus_pt)
        for _ in range(int(g)):
            mod = mod * one_minus_pt
    else:                                          # non-integer gamma: EUP pow
        mod = jnp.power(one_minus_pt, jnp.float32(g))

    alpha_e = jnp.where(is_pos, jnp.float32(alpha), jnp.float32(1.0 - alpha))
    return alpha_e * (mod * neg_ce)                # <= 0 everywhere


def _partial_sum(terms):
    # Per-tile partial sums kept as one lane-dense (8, 128) vreg: folding the
    # sublane-major axis is pure VALU adds (no XLU cross-lane reduce in the kernel).
    rows = terms.shape[0]
    return jnp.sum(terms.reshape(rows // _SUBLANES, _SUBLANES, _LANES), axis=0)


def _focal_kernel_packed(prob_ref, tgt_ref, out_ref, *, gamma, alpha, num_classes):
    """Main path (C divides 128, i.e. C is a power of two <= 128).

    prob_ref: (tile_rows, 128) f32 lane-dense probabilities.
    tgt_ref:  (tile_rows, 128 // C) f32 per-anchor labels (-1 = background/padding).
    """
    prob = prob_ref[...]
    tgt_rows = tgt_ref[...]
    a = tgt_rows.shape[1]
    shift = num_classes.bit_length() - 1            # C is a power of two

    # E[j, l] = 1 iff lane l belongs to the j-th anchor of its row (l // C == j).
    lane = lax.broadcasted_iota(jnp.int32, (a, _LANES), 1)
    arow = lax.broadcasted_iota(jnp.int32, (a, _LANES), 0)
    expand = ((lane >> shift) == arow).astype(jnp.float32)

    # MXU is otherwise idle: replicate each anchor's label across its C lanes.
    tgt_lane = jnp.dot(tgt_rows, expand, preferred_element_type=jnp.float32)

    cls = (lax.broadcasted_iota(jnp.int32, (1, _LANES), 1) & (num_classes - 1)
           ).astype(jnp.float32)
    is_pos = tgt_lane == cls                        # exact small-integer f32 compare

    out_ref[...] = _partial_sum(_focal_terms(prob, is_pos, gamma=gamma, alpha=alpha))


def _focal_kernel_perelem(prob_ref, tgt_ref, cls_ref, out_ref, *, gamma, alpha):
    """Fallback path (general C): per-element labels + class-index tile."""
    prob = prob_ref[...]
    is_pos = cls_ref[...].astype(jnp.int32) == tgt_ref[...].astype(jnp.int32)
    out_ref[...] = _partial_sum(_focal_terms(prob, is_pos, gamma=gamma, alpha=alpha))


def focal_loss_with_prob_pallas(prob, target, weight=None, *, gamma=2.0, alpha=0.25,
                                loss_weight=1.0, reduction="mean", avg_factor=None):
    """FocalLossWithProb forward (TOOD variant). Supports 'mean' and 'sum'."""
    # TODO(synk): per-prediction `weight` and reduction='none' (per-element loss map)
    # are not wired into the kernel; module defaults only.
    if weight is not None:
        raise NotImplementedError("per-prediction weight is not implemented")
    if reduction not in ("mean", "sum"):
        raise NotImplementedError("only 'mean' and 'sum' reductions are implemented")

    N, C = prob.shape
    total = N * C
    rows = _cdiv(total, _LANES)

    # Background label (== C) is remapped to -1 so it never matches any class column.
    tgt_i32 = target.astype(jnp.int32)
    tgt_valid = jnp.where(tgt_i32 >= C, jnp.int32(-1), tgt_i32)

    packed = (C <= _LANES) and (_LANES % C == 0)          # C in {1, 2, 4, ..., 128}
    if packed:
        unit = 32                                         # sublane granule only
        resident_cls = True
    else:
        anchor_rows = C // math.gcd(C, _LANES)            # rows per whole-anchor period
        unit = math.lcm(32, anchor_rows)
        resident_cls = unit <= _MAX_TILE_ROWS             # same class pattern every tile
        if not resident_cls:                              # pathological C: per-step cls
            unit = 32

    tile_rows, num_tiles = _plan_tiles(rows, unit)
    rows_pad = tile_rows * num_tiles
    elems_pad = rows_pad * _LANES

    # Single fused flatten+pad pass of prob — the only full-size wrapper op left.
    # Padded elements get prob = 0 and a -1 label -> pt = 1 -> zero loss.
    # TODO(synk): if prob comes from a sigmoid over logits upstream, pass the logits
    # and fold the sigmoid into the kernel (free EUP slot) to drop this copy too.
    prob_flat = jnp.pad(prob.reshape(-1), (0, elems_pad - total)).reshape(rows_pad, _LANES)

    if packed:
        a = _LANES // C
        anchors_pad = rows_pad * a
        tgt_rows = jnp.pad(tgt_valid.astype(jnp.float32), (0, anchors_pad - N),
                           constant_values=-1.0).reshape(rows_pad, a)
        kernel = functools.partial(_focal_kernel_packed, gamma=gamma, alpha=alpha,
                                   num_classes=C)
        operands = (prob_flat, tgt_rows)
        in_specs = [
            pl.BlockSpec((tile_rows, _LANES), lambda i: (i, 0)),
            pl.BlockSpec((tile_rows, a), lambda i: (i, 0)),
        ]
        label_bytes = anchors_pad * 4
    else:
        if C <= 127:
            ldtype = jnp.int8
        elif C <= 32767:
            ldtype = jnp.int16
        else:
            ldtype = jnp.int32
        isz = jnp.dtype(ldtype).itemsize
        # TODO(synk): this per-element label stream could be shrunk further to a
        # 1-bit mask at the cost of an in-kernel unpack.
        tgt_elem = jnp.pad(jnp.repeat(tgt_valid, C), (0, elems_pad - total),
                           constant_values=-1).astype(ldtype).reshape(rows_pad, _LANES)
        kernel = functools.partial(_focal_kernel_perelem, gamma=gamma, alpha=alpha)
        if resident_cls:
            # Tiles cover whole anchors, so one class-index tile is valid for every
            # grid step; constant index_map -> fetched once, stays resident in VMEM.
            cls_tile = jnp.asarray(
                (np.arange(tile_rows * _LANES, dtype=np.int64) % C)
                .astype(np.dtype(ldtype)).reshape(tile_rows, _LANES))
            cls_spec = pl.BlockSpec((tile_rows, _LANES), lambda i: (0, 0))
            label_bytes = elems_pad * isz + tile_rows * _LANES * isz
        else:
            cls_tile = (lax.iota(jnp.int32, elems_pad) % C).astype(ldtype
                        ).reshape(rows_pad, _LANES)
            cls_spec = pl.BlockSpec((tile_rows, _LANES), lambda i: (i, 0))
            label_bytes = 2 * elems_pad * isz
        operands = (prob_flat, tgt_elem, cls_tile)
        in_specs = [
            pl.BlockSpec((tile_rows, _LANES), lambda i: (i, 0)),
            pl.BlockSpec((tile_rows, _LANES), lambda i: (i, 0)),
            cls_spec,
        ]

    out_rows = num_tiles * _SUBLANES
    cost = pl.CostEstimate(
        flops=int(10 * elems_pad),
        transcendentals=int(elems_pad),
        bytes_accessed=int(elems_pad * 4 + label_bytes + out_rows * _LANES * 4),
    )

    partials = pl.pallas_call(
        kernel,
        out_shape=jax.ShapeDtypeStruct((out_rows, _LANES), jnp.float32),
        grid_spec=pltpu.PrefetchScalarGridSpec(
            num_scalar_prefetch=0,
            grid=(num_tiles,),
            in_specs=in_specs,
            out_specs=pl.BlockSpec((_SUBLANES, _LANES), lambda i: (i, 0)),
        ),
        compiler_params=pltpu.CompilerParams(
            dimension_semantics=("parallel",),
            vmem_limit_bytes=32 * 1024 * 1024,
        ),
        cost_estimate=cost,
    )(*operands)

    # The kernel accumulates the *negated* focal terms; negate once here.
    total_sum = -jnp.sum(partials, dtype=jnp.float32)
    if reduction == "mean":
        denom = jnp.float32(avg_factor) if avg_factor is not None else jnp.float32(total)
        total_sum = total_sum / denom
    return jnp.float32(loss_weight) * total_sum


def _reference_jax(prob, target, gamma=2.0, alpha=0.25, loss_weight=1.0):
    N, C = prob.shape
    one_hot = jax.nn.one_hot(target, C + 1, dtype=prob.dtype)[:, :-1]
    flatten_alpha = jnp.where(one_hot == 1, alpha, 1.0 - alpha)
    pt = jnp.where(one_hot == 1, prob, 1.0 - prob)
    log_p = jnp.maximum(jnp.log(prob), -100.0)        # PyTorch BCE log clamp
    log_1p = jnp.maximum(jnp.log(1.0 - prob), -100.0)
    ce = -(one_hot * log_p + (1.0 - one_hot) * log_1p)
    loss = flatten_alpha * jnp.power(1.0 - pt, gamma) * ce
    return loss_weight * loss.mean()


if __name__ == "__main__":
    key = jax.random.PRNGKey(0)
    k1, k2, k3, k4 = jax.random.split(key, 4)

    # Case 1: C = 16 (divides 128) -> packed per-anchor-label path (MXU expansion).
    N1, C1 = 256, 16
    prob1 = jax.nn.sigmoid(jax.random.normal(k1, (N1, C1), dtype=jnp.float32))
    target1 = jax.random.randint(k2, (N1,), 0, C1 + 1)     # label C == background
    loss1 = focal_loss_with_prob_pallas(prob1, target1, gamma=2.0, alpha=0.25,
                                        loss_weight=1.0)
    loss1 = jax.block_until_ready(loss1)
    ref1 = _reference_jax(prob1, target1)
    assert jnp.allclose(loss1, ref1, rtol=1e-5, atol=1e-6), (loss1, ref1)

    # Case 2: C = 12 (does not divide 128) -> per-element-label fallback path.
    N2, C2 = 64, 12
    prob2 = jax.nn.sigmoid(jax.random.normal(k3, (N2, C2), dtype=jnp.float32))
    target2 = jax.random.randint(k4, (N2,), 0, C2 + 1)
    loss2 = focal_loss_with_prob_pallas(prob2, target2, gamma=2.0, alpha=0.25,
                                        loss_weight=1.0)
    loss2 = jax.block_until_ready(loss2)
    ref2 = _reference_jax(prob2, target2)
    assert jnp.allclose(loss2, ref2, rtol=1e-5, atol=1e-6), (loss2, ref2)

    print("KERNEL_OK")
</pallas_src>

<mosaic_0001>
module attributes {stable_mosaic.version = 11 : i64} {
  func.func @_focal_kernel_packed(%arg0: i32, %arg1: memref<32x128xf32, #tpu.memory_space<vmem>>, %arg2: memref<32x8xf32, #tpu.memory_space<vmem>>, %arg3: memref<8x128xf32, #tpu.memory_space<vmem>>) attributes {dimension_semantics = [#tpu.dimension_semantics<parallel>], iteration_bounds = array<i64: 1>, scalar_prefetch = 0 : i64, scratch_operands = 0 : i64, tpu.core_type = #tpu.core_type<tc>, window_params = [{transform_indices = @transform_0, window_bounds = array<i64: 32, 128>}, {transform_indices = @transform_1, window_bounds = array<i64: 32, 8>}, {transform_indices = @transform_2, window_bounds = array<i64: 8, 128>}]} {
    %c0 = arith.constant 0 : index
    %c0_0 = arith.constant 0 : index
    %0 = vector.load %arg1[%c0, %c0_0] : memref<32x128xf32, #tpu.memory_space<vmem>>, vector<32x128xf32>
    %c0_1 = arith.constant 0 : index
    %c0_2 = arith.constant 0 : index
    %1 = vector.load %arg2[%c0_1, %c0_2] : memref<32x8xf32, #tpu.memory_space<vmem>>, vector<32x8xf32>
    %2 = tpu.iota {dimensions = array<i32: 1>} : vector<8x128xi32>
    %3 = tpu.iota {dimensions = array<i32: 0>} : vector<8x128xi32>
    %c4_i32 = arith.constant 4 : i32
    %4 = vector.broadcast %c4_i32 : i32 to vector<8x128xi32>
    %5 = arith.shrsi %2, %4 : vector<8x128xi32>
    %6 = arith.cmpi eq, %5, %3 : vector<8x128xi32>
    %7 = arith.extui %6 : vector<8x128xi1> to vector<8x128xi32>
    %8 = arith.sitofp %7 : vector<8x128xi32> to vector<8x128xf32>
    %cst = arith.constant dense<0.000000e+00> : vector<32x128xf32>
    %9 = tpu.matmul %1, %8, %cst {dimension_numbers = #tpu.dot_dimension_numbers<[1], [0], [0], [1], [0, 0, 1, 1], [], []>} : vector<32x8xf32>, vector<8x128xf32>, vector<32x128xf32> -> vector<32x128xf32>
    %10 = tpu.iota {dimensions = array<i32: 1>} : vector<1x128xi32>
    %c15_i32 = arith.constant 15 : i32
    %11 = vector.broadcast %c15_i32 : i32 to vector<1x128xi32>
    %12 = arith.andi %10, %11 : vector<1x128xi32>
    %13 = arith.sitofp %12 : vector<1x128xi32> to vector<1x128xf32>
    %14 = vector.broadcast %13 : vector<1x128xf32> to vector<32x128xf32>
    %15 = arith.cmpf oeq, %9, %14 : vector<32x128xf32>
    %cst_3 = arith.constant 1.000000e+00 : f32
    %16 = vector.broadcast %cst_3 : f32 to vector<32x128xf32>
    %17 = arith.subf %16, %0 : vector<32x128xf32>
    %18 = arith.select %15, %0, %17 : vector<32x128xi1>, vector<32x128xf32>
    %19 = arith.select %15, %17, %0 : vector<32x128xi1>, vector<32x128xf32>
    %20 = math.log %18 : vector<32x128xf32>
    %cst_4 = arith.constant -1.000000e+02 : f32
    %21 = vector.broadcast %cst_4 : f32 to vector<32x128xf32>
    %22 = arith.maximumf %20, %21 : vector<32x128xf32>
    %23 = arith.mulf %19, %19 : vector<32x128xf32>
    %cst_5 = arith.constant 2.500000e-01 : f32
    %cst_6 = arith.constant 7.500000e-01 : f32
    %24 = vector.broadcast %cst_5 : f32 to vector<32x128xf32>
    %25 = vector.broadcast %cst_6 : f32 to vector<32x128xf32>
    %26 = arith.select %15, %24, %25 : vector<32x128xi1>, vector<32x128xf32>
    %27 = arith.mulf %23, %22 : vector<32x128xf32>
    %28 = arith.mulf %26, %27 : vector<32x128xf32>
    %29 = vector.shape_cast %28 : vector<32x128xf32> to vector<4x8x128xf32>
    %cst_7 = arith.constant dense<0.000000e+00> : vector<8x128xf32>
    %30 = vector.multi_reduction <add>, %29, %cst_7 [0] : vector<4x8x128xf32> to vector<8x128xf32>
    %c0_8 = arith.constant 0 : index
    %c0_9 = arith.constant 0 : index
    %31 = vector.load %arg3[%c0_8, %c0_9] : memref<8x128xf32, #tpu.memory_space<vmem>>, vector<8x128xf32>
    tpu.vector_store %arg3[%c0_8, %c0_9], %30 {strides = array<i32>} : memref<8x128xf32, #tpu.memory_space<vmem>>, vector<8x128xf32>,
    return
  }
  func.func @transform_0(%arg0: i32) -> (i32, i32) {
    %c0_i32 = arith.constant 0 : i32
    %c0_i32_0 = arith.constant 0 : i32
    return %arg0, %c0_i32 : i32, i32
  }
  func.func @transform_1(%arg0: i32) -> (i32, i32) {
    %c0_i32 = arith.constant 0 : i32
    %c0_i32_0 = arith.constant 0 : i32
    return %arg0, %c0_i32 : i32, i32
  }
  func.func @transform_2(%arg0: i32) -> (i32, i32) {
    %c0_i32 = arith.constant 0 : i32
    %c0_i32_0 = arith.constant 0 : i32
    return %arg0, %c0_i32 : i32, i32
  }
}

</mosaic_0001>

<bundles_post_ra>
// kernel: tpu_custom_call.1
= control target key start
LH: loop header
LB: loop body
LE: loop exit
PB: predicated region body
PF: predicated region fallthrough
CT: control target
= control target key end

     0   :  { %v20_v0 = vlaneseq  ;;  %s239_s0 = inlined_call_operand.vmem [shape: f32[32,128], index: 0, kind: input, shape index: {}]   ;;  %s240_s1 = inlined_call_operand.vmem [shape: f32[32,8], index: 1, kind: input, shape index: {}]   ;;  %s241_s2 = inlined_call_operand.hbm [shape: f32[8,128], index: 2, kind: output, shape index: {}]  }
   0x1   :  { %7 = vsyncpa [#allocation3], 0  ;;  %v16_v4 = vld [vmem:[%s240_s1] sm:$0xff]  ;;  %vm28_vm1 = vcmask 64512   ;;  %v17_v5 = vld [vmem:[%s240_s1 + $0x8] sm:$0xff]  ;;  %v182_v6 = vmov 1.0  }
   0x2   :  { %v21_v1 = vand.u32 127, %v20_v0  ;;  %v23_v2 = vshrl.u32 %v20_v0, 7  ;;  %v18_v7 = vld [vmem:[%s240_s1 + $0x10] sm:$0xff]  ;;  %v19_v8 = vld [vmem:[%s240_s1 + $0x18] sm:$0xff]  ;;  %v12_v10 = vld [vmem:[%s239_s0] sm:$0xff]  ;;  %v183_v44 = vmov 0.75  }
   0x3   :  { %v13_v11 = vld [vmem:[%s239_s0 + $0x8] sm:$0xff]  ;;  %v76_v13 = vsub.f32 1.0, %v12_v10  ;;  %v14_v19 = vld [vmem:[%s239_s0 + $0x10] sm:$0xff]  ;;  %v15_v20 = vld [vmem:[%s239_s0 + $0x18] sm:$0xff]  ;;  %s184_s0 = smov [#allocation2]   ;;  %s127_s27 = sshll.u32 %s241_s2, 4  ;;  %s128_s27 = int_to_ptr.hbm [resolvable:$true] %s127_s27 }
   0x4   :  { %v24_v3 = vshra.s32 %v21_v1, 4  ;;  %v70_v9 = vand.u32 15, %v21_v1  ;;  %v77_v14 = vsub.f32 1.0, %v13_v11  ;;  %v78_v21 = vsub.f32 1.0, %v14_v19  ;;  %s125_s24 = sshll.u32 %s184_s0, 4  ;;  %s126_s24 = int_to_ptr.vmem [resolvable:$true] %s125_s24 }
   0x5   :  { %v79_v22 = vsub.f32 1.0, %v15_v20 }
   0x6   :  { %vm25_vm0 = vcmp.eq.s32.totalorder %v24_v3, %v23_v2  ;;  %v71_v12 = vcvt.s32.f32 %v70_v9 }
   0x7   :  { %137 = vmatpush.msk.msra.mxu0 %vm25_vm0, %v182_v6  ;;  %142 = vmatpush.msk.msra.mxu1 %vm25_vm0, %v182_v6 }
   0x8   :  { %143 = vmatpush.msk.msra.mxu2 %vm25_vm0, %v182_v6  ;;  %144 = vmatpush.msk.msra.mxu3 %vm25_vm0, %v182_v6 }
   0x9   :  { %138 = vmatmul.msk.f32.vlgmr.msra.gmra.mxu0 %vm28_vm1, %v16_v4  ;;  %139 = vmatmul.msk.f32.vlgmr.msra.gmra.mxu1 %vm28_vm1, %v17_v5 }
   0xa   :  { %140 = vmatmul.msk.f32.vlgmr.msra.gmra.mxu2 %vm28_vm1, %v18_v7  ;;  %141 = vmatmul.msk.f32.vlgmr.msra.gmra.mxu3 %vm28_vm1, %v19_v8 }
  0x86   :  { %v58_v15 = vpop.f32.mrf.mxu0  ;;  %v61_v16 = vpop.f32.mrf.mxu1 }
  0x87   :  { %vm72_vm2 = vcmp.eq.f32.partialorder %v58_v15, %v71_v12  ;;  %vm73_vm3 = vcmp.eq.f32.partialorder %v61_v16, %v71_v12 }
  0x88   :  { %v80_v17 = vsel %vm72_vm2, %v12_v10, %v76_v13  ;;  %v81_v18 = vsel %vm73_vm3, %v13_v11, %v77_v14  ;;  %v84_v29 = vsel %vm72_vm2, %v76_v13, %v12_v10  ;;  %v85_v31 = vsel %vm73_vm3, %v77_v14, %v13_v11 }
  0x89   :  { %148 = vlog2.f32 %v80_v17  ;;  %v100_v34 = vmul.f32 %v84_v29, %v84_v29  ;;  %v101_v36 = vmul.f32 %v85_v31, %v85_v31  ;;  %v104_v45 = vsel %vm72_vm2, 0.25, %v183_v44 }
  0x8a   :  { %150 = vlog2.f32 %v81_v18  ;;  %v105_v46 = vsel %vm73_vm3, 0.25, %v183_v44 }
  0x8d   :  { %v64_v23 = vpop.f32.mrf.mxu2  ;;  %v67_v24 = vpop.f32.mrf.mxu3 }
  0x8e   :  { %vm74_vm4 = vcmp.eq.f32.partialorder %v64_v23, %v71_v12  ;;  %vm75_vm5 = vcmp.eq.f32.partialorder %v67_v24, %v71_v12 }
  0x8f   :  { %v149_v25 = vpop.eup %148  ;;  %v82_v26 = vsel %vm74_vm4, %v14_v19, %v78_v21  ;;  %v83_v27 = vsel %vm75_vm5, %v15_v20, %v79_v22  ;;  %v86_v40 = vsel %vm74_vm4, %v78_v21, %v14_v19  ;;  %v87_v43 = vsel %vm75_vm5, %v79_v22, %v15_v20 }
  0x90   :  { %v151_v28 = vpop.eup %150  ;;  %v89_v30 = vmul.f32 0.6931472, %v149_v25  ;;  %152 = vlog2.f32 %v82_v26  ;;  %v102_v51 = vmul.f32 %v86_v40, %v86_v40  ;;  %v103_v53 = vmul.f32 %v87_v43, %v87_v43 }
  0x91   :  { %v91_v32 = vmul.f32 0.6931472, %v151_v28  ;;  %154 = vlog2.f32 %v83_v27  ;;  %v106_v55 = vsel %vm74_vm4, 0.25, %v183_v44  ;;  %v107_v59 = vsel %vm75_vm5, 0.25, %v183_v44 }
  0x92   :  { %v96_v33 = vmax.f32 %v89_v30, -100.0 }
  0x93   :  { %v97_v35 = vmax.f32 %v91_v32, -100.0 }
  0x94   :  { %v108_v37 = vmul.f32 %v100_v34, %v96_v33 }
  0x95   :  { %v109_v38 = vmul.f32 %v101_v36, %v97_v35 }
  0x96   :  { %v153_v39 = vpop.eup %152  ;;  %v112_v48 = vmul.f32 %v108_v37, %v104_v45 }
  0x97   :  { %v155_v41 = vpop.eup %154  ;;  %v93_v42 = vmul.f32 0.6931472, %v153_v39  ;;  %v113_v49 = vmul.f32 %v109_v38, %v105_v46 }
  0x98   :  { %v95_v47 = vmul.f32 0.6931472, %v155_v41 }
  0x99   :  { %v98_v50 = vmax.f32 %v93_v42, -100.0  ;;  %v116_v57 = vadd.f32 %v113_v49, %v112_v48 }
  0x9a   :  { %v99_v52 = vmax.f32 %v95_v47, -100.0 }
  0x9b   :  { %v110_v54 = vmul.f32 %v102_v51, %v98_v50 }
  0x9c   :  { %v111_v56 = vmul.f32 %v103_v53, %v99_v52 }
  0x9d   :  { %v114_v58 = vmul.f32 %v110_v54, %v106_v55 }
  0x9e   :  { %v115_v61 = vmul.f32 %v111_v56, %v107_v59 }
  0x9f   :  { %v117_v60 = vadd.f32 %v116_v57, %v114_v58 }
  0xa1   :  { %v118_v62 = vadd.f32 %v117_v60, %v115_v61 }
  0xa3   :  { %119 = vst [vmem:[#allocation2] sm:$0xff] %v118_v62 }
  0xa4   :  { %130 = dma.vmem_to_hbm [thread:$0]  %s126_s24, 128, %s128_s27, [#allocation3]  }
  0xa5   :  { %180 = dma.done.wait [#allocation3], 128  }
  0xa6   :  { %181 = vsyncadd [#allocation3], 4294967168 }
  0xa7   :  { %135 = vsyncpa [#allocation3], 1 }

</bundles_post_ra>
